<compile_context>
chip_gen: v7x
topology: tpu7x:2x2x1
jax: 0.10.0
libtpu: 0.0.40
codegen_flags: <defaults>
</compile_context>

<pallas_src>
import jax
import jax.numpy as jnp
from jax.experimental import pallas as pl
from jax.experimental.pallas import tpu as pltpu  # noqa: F401  (TPU backend)

BN_EPS = 1e-5


def generator_kernel(x_ref, w1_ref, bn_ref, w2_ref, w3_ref, out_ref):
    twoC = w2_ref.shape[1]  # 2 * outchannel

    def bn_relu(h, g, b):
        # training-mode BatchNorm1d: batch stats, biased variance, eps=1e-5.
        mu = jnp.mean(h, axis=0, keepdims=True)
        hc = h - mu                                    # computed once, reused
        var = jnp.mean(hc * hc, axis=0, keepdims=True)
        s = g * jax.lax.rsqrt(var + BN_EPS)            # fold scale on (1, F) row
        return jnp.maximum(hc * s + b, 0.0)

    # ---- layer 1: fused Linear(64 -> 4C), both branches, one bf16 matmul ----
    x16 = x_ref[...].astype(jnp.bfloat16)
    h = jnp.dot(x16, w1_ref[...], preferred_element_type=jnp.float32)
    h = bn_relu(h, bn_ref[0:1, :], bn_ref[1:2, :])

    # ---- layer 2: per-branch Linear(2C -> 2C) on the 128-lane halves --------
    h16 = h.astype(jnp.bfloat16)
    hm = jnp.dot(h16[:, :twoC], w2_ref[0], preferred_element_type=jnp.float32)
    hs = jnp.dot(h16[:, twoC:], w2_ref[1], preferred_element_type=jnp.float32)
    hm = bn_relu(hm, bn_ref[2:3, :twoC], bn_ref[3:4, :twoC])
    hs = bn_relu(hs, bn_ref[2:3, twoC:], bn_ref[3:4, twoC:])

    # ---- layer 3: per-branch Linear(2C -> C) -> one lane-dense (B, 2C) store
    om = jnp.dot(hm.astype(jnp.bfloat16), w3_ref[0],
                 preferred_element_type=jnp.float32)
    os = jnp.dot(hs.astype(jnp.bfloat16), w3_ref[1],
                 preferred_element_type=jnp.float32)
    out_ref[...] = jnp.concatenate([om, os], axis=1).astype(out_ref.dtype)


def generator_forward(x, fused):
    """x: (B, 64) f32. fused: dict from fuse_params(). Returns (mean, std)."""
    B = x.shape[0]
    twoC, C = fused["w3"].shape[1], fused["w3"].shape[2]

    args = (x, fused["w1"], fused["bn"], fused["w2"], fused["w3"])

    def full_spec(shape):
        # shape is bound per call -> no late-binding closure bug
        return pl.BlockSpec(shape, lambda: (0,) * len(shape))

    flops = 2 * B * (64 * 2 * twoC + 2 * twoC * twoC + 2 * twoC * C)
    bytes_accessed = int(sum(a.size * a.dtype.itemsize for a in args)
                         + B * twoC * 4)

    out = pl.pallas_call(
        generator_kernel,
        out_shape=jax.ShapeDtypeStruct((B, twoC), jnp.float32),
        in_specs=[full_spec(a.shape) for a in args],
        out_specs=full_spec((B, twoC)),
        cost_estimate=pl.CostEstimate(flops=flops, transcendentals=4 * twoC,
                                      bytes_accessed=bytes_accessed),
    )(*args)

    return out[:, :C], out[:, C:]


def init_params(key, outchannel):
    """Deterministic synthetic parameters matching the PyTorch module shapes.

    PyTorch Linear stores weight as (out, in); we store the transpose (in, out)
    and keep Linear weights in bfloat16 (fed natively to the MXU).
    BatchNorm1d gamma/beta are kept 2-D (1, feat), float32.
    """
    C = outchannel
    ks = jax.random.split(key, 10)

    def lin(k, fan_in, fan_out):
        bound = 1.0 / jnp.sqrt(fan_in)
        w = jax.random.uniform(k, (fan_in, fan_out), jnp.float32, -bound, bound)
        return w.astype(jnp.bfloat16)

    def bn(kg, kb, feat):
        gamma = 1.0 + 0.1 * jax.random.normal(kg, (1, feat), jnp.float32)
        beta = 0.1 * jax.random.normal(kb, (1, feat), jnp.float32)
        return gamma, beta

    gm1, bm1 = bn(ks[2], ks[3], 2 * C)
    gm2, bm2 = bn(ks[4], ks[5], 2 * C)
    gs1, bs1 = bn(ks[6], ks[7], 2 * C)
    gs2, bs2 = bn(ks[8], ks[9], 2 * C)

    kk = jax.random.split(ks[0], 6)
    return dict(
        wm1=lin(kk[0], 64, 2 * C), wm2=lin(kk[1], 2 * C, 2 * C), wm3=lin(kk[2], 2 * C, C),
        ws1=lin(kk[3], 64, 2 * C), ws2=lin(kk[4], 2 * C, 2 * C), ws3=lin(kk[5], 2 * C, C),
        gm1=gm1, bm1=bm1, gm2=gm2, bm2=bm2,
        gs1=gs1, bs1=bs1, gs2=gs2, bs2=bs2,
    )


def fuse_params(p):
    """One-time packing of the two branches into kernel operands.

    w1 : (64, 4C)   bf16  concat of the two layer-1 weights (shared matmul)
    bn : (4, 4C)    f32   rows = [gamma1 | beta1 | gamma2 | beta2], each row
                          being the concat [mean-branch | std-branch]
    w2 : (2, 2C, 2C) bf16 stacked per-branch layer-2 weights (no zero padding)
    w3 : (2, 2C, C)  bf16 stacked per-branch layer-3 weights (no zero padding)
    """
    w1 = jnp.concatenate([p["wm1"], p["ws1"]], axis=1)                 # (64, 4C)
    bn = jnp.concatenate([
        jnp.concatenate([p["gm1"], p["gs1"]], axis=1),
        jnp.concatenate([p["bm1"], p["bs1"]], axis=1),
        jnp.concatenate([p["gm2"], p["gs2"]], axis=1),
        jnp.concatenate([p["bm2"], p["bs2"]], axis=1),
    ], axis=0).astype(jnp.float32)                                     # (4, 4C)
    w2 = jnp.stack([p["wm2"], p["ws2"]], axis=0)                       # (2,2C,2C)
    w3 = jnp.stack([p["wm3"], p["ws3"]], axis=0)                       # (2,2C,C)
    return dict(w1=w1, bn=bn, w2=w2, w3=w3)


def _reference(x, p):
    """Pure-JAX f32 reference on the original (unfused) per-branch parameters."""
    f32 = jnp.float32

    def bnorm(h, g, b):
        mu = jnp.mean(h, axis=0, keepdims=True)
        var = jnp.mean((h - mu) ** 2, axis=0, keepdims=True)
        return (h - mu) * jax.lax.rsqrt(var + BN_EPS) * g + b

    def branch(w1, g1, b1, w2, g2, b2, w3):
        h = jnp.maximum(bnorm(x @ w1.astype(f32), g1, b1), 0.0)
        h = jnp.maximum(bnorm(h @ w2.astype(f32), g2, b2), 0.0)
        return h @ w3.astype(f32)

    return (
        branch(p["wm1"], p["gm1"], p["bm1"], p["wm2"], p["gm2"], p["bm2"], p["wm3"]),
        branch(p["ws1"], p["gs1"], p["bs1"], p["ws2"], p["gs2"], p["bs2"], p["ws3"]),
    )


if __name__ == "__main__":
    key = jax.random.PRNGKey(0)
    kx, kp = jax.random.split(key)

    B = 8            # batch (BatchNorm1d training mode needs batch > 1)
    OUTCHANNEL = 64  # hidden width 2*C = 128, fused layer-1 width 4*C = 256

    x = jax.random.normal(kx, (B, 64), jnp.float32)
    params = init_params(kp, OUTCHANNEL)
    fused = fuse_params(params)

    mean_vec, std_vec = generator_forward(x, fused)
    mean_vec, std_vec = jax.block_until_ready((mean_vec, std_vec))

    ref_mean, ref_std = _reference(x, params)
    assert mean_vec.shape == (B, OUTCHANNEL) and std_vec.shape == (B, OUTCHANNEL)
    # bf16 activations feeding the MXU (vs the f32 reference) cost a few tenths
    # of a percent of relative error per layer -> compare with 3e-2 tolerance.
    assert jnp.allclose(mean_vec, ref_mean, atol=3e-2, rtol=3e-2)
    assert jnp.allclose(std_vec, ref_std, atol=3e-2, rtol=3e-2)

    print("KERNEL_OK")
</pallas_src>

<mosaic_0001>
module attributes {stable_mosaic.version = 11 : i64} {
  func.func @generator_kernel(%arg0: memref<8x64xf32, #tpu.memory_space<vmem>>, %arg1: memref<64x256xbf16, #tpu.memory_space<vmem>>, %arg2: memref<4x256xf32, #tpu.memory_space<vmem>>, %arg3: memref<2x128x128xbf16, #tpu.memory_space<vmem>>, %arg4: memref<2x128x64xbf16, #tpu.memory_space<vmem>>, %arg5: memref<8x128xf32, #tpu.memory_space<vmem>>) attributes {dimension_semantics = [], scalar_prefetch = 0 : i64, scratch_operands = 0 : i64, tpu.core_type = #tpu.core_type<tc>} {
    %c0 = arith.constant 0 : index
    %c0_0 = arith.constant 0 : index
    %0 = vector.load %arg0[%c0, %c0_0] : memref<8x64xf32, #tpu.memory_space<vmem>>, vector<8x64xf32>
    %1 = arith.truncf %0 : vector<8x64xf32> to vector<8x64xbf16>
    %c0_1 = arith.constant 0 : index
    %c0_2 = arith.constant 0 : index
    %2 = vector.load %arg1[%c0_1, %c0_2] : memref<64x256xbf16, #tpu.memory_space<vmem>>, vector<64x256xbf16>
    %cst = arith.constant dense<0.000000e+00> : vector<8x256xf32>
    %3 = tpu.matmul %1, %2, %cst {dimension_numbers = #tpu.dot_dimension_numbers<[1], [0], [0], [1], [0, 0, 1, 1], [], []>} : vector<8x64xbf16>, vector<64x256xbf16>, vector<8x256xf32> -> vector<8x256xf32>
    %c0_3 = arith.constant 0 : index
    %c0_4 = arith.constant 0 : index
    %4 = vector.load %arg2[%c0_3, %c0_4] : memref<4x256xf32, #tpu.memory_space<vmem>>, vector<1x256xf32>
    %c1 = arith.constant 1 : index
    %c0_5 = arith.constant 0 : index
    %5 = vector.load %arg2[%c1, %c0_5] : memref<4x256xf32, #tpu.memory_space<vmem>>, vector<1x256xf32>
    %cst_6 = arith.constant dense<0.000000e+00> : vector<256xf32>
    %6 = vector.multi_reduction <add>, %3, %cst_6 [0] : vector<8x256xf32> to vector<256xf32>
    %7 = vector.shape_cast %6 : vector<256xf32> to vector<1x256xf32>
    %cst_7 = arith.constant 8.000000e+00 : f32
    %8 = vector.broadcast %cst_7 : f32 to vector<1x256xf32>
    %9 = arith.divf %7, %8 : vector<1x256xf32>
    %10 = vector.broadcast %9 : vector<1x256xf32> to vector<8x256xf32>
    %11 = arith.subf %3, %10 : vector<8x256xf32>
    %12 = arith.mulf %11, %11 : vector<8x256xf32>
    %cst_8 = arith.constant dense<0.000000e+00> : vector<256xf32>
    %13 = vector.multi_reduction <add>, %12, %cst_8 [0] : vector<8x256xf32> to vector<256xf32>
    %14 = vector.shape_cast %13 : vector<256xf32> to vector<1x256xf32>
    %cst_9 = arith.constant 8.000000e+00 : f32
    %15 = vector.broadcast %cst_9 : f32 to vector<1x256xf32>
    %16 = arith.divf %14, %15 : vector<1x256xf32>
    %cst_10 = arith.constant 9.99999974E-6 : f32
    %17 = vector.broadcast %cst_10 : f32 to vector<1x256xf32>
    %18 = arith.addf %16, %17 : vector<1x256xf32>
    %19 = math.rsqrt %18 : vector<1x256xf32>
    %20 = arith.mulf %4, %19 : vector<1x256xf32>
    %21 = vector.broadcast %20 : vector<1x256xf32> to vector<8x256xf32>
    %22 = arith.mulf %11, %21 : vector<8x256xf32>
    %23 = vector.broadcast %5 : vector<1x256xf32> to vector<8x256xf32>
    %24 = arith.addf %22, %23 : vector<8x256xf32>
    %cst_11 = arith.constant 0.000000e+00 : f32
    %25 = vector.broadcast %cst_11 : f32 to vector<8x256xf32>
    %26 = arith.maximumf %24, %25 : vector<8x256xf32>
    %27 = arith.truncf %26 : vector<8x256xf32> to vector<8x256xbf16>
    %28 = vector.extract_strided_slice %27 {offsets = [0, 0], sizes = [8, 128], strides = [1, 1]} : vector<8x256xbf16> to vector<8x128xbf16>
    %c0_12 = arith.constant 0 : index
    %c0_13 = arith.constant 0 : index
    %c0_14 = arith.constant 0 : index
    %29 = vector.load %arg3[%c0_12, %c0_13, %c0_14] : memref<2x128x128xbf16, #tpu.memory_space<vmem>>, vector<1x128x128xbf16>
    %30 = vector.shape_cast %29 : vector<1x128x128xbf16> to vector<128x128xbf16>
    %cst_15 = arith.constant dense<0.000000e+00> : vector<8x128xf32>
    %31 = tpu.matmul %28, %30, %cst_15 {dimension_numbers = #tpu.dot_dimension_numbers<[1], [0], [0], [1], [0, 0, 1, 1], [], []>} : vector<8x128xbf16>, vector<128x128xbf16>, vector<8x128xf32> -> vector<8x128xf32>
    %32 = vector.extract_strided_slice %27 {offsets = [0, 128], sizes = [8, 128], strides = [1, 1]} : vector<8x256xbf16> to vector<8x128xbf16>
    %c1_16 = arith.constant 1 : index
    %c0_17 = arith.constant 0 : index
    %c0_18 = arith.constant 0 : index
    %33 = vector.load %arg3[%c1_16, %c0_17, %c0_18] : memref<2x128x128xbf16, #tpu.memory_space<vmem>>, vector<1x128x128xbf16>
    %34 = vector.shape_cast %33 : vector<1x128x128xbf16> to vector<128x128xbf16>
    %cst_19 = arith.constant dense<0.000000e+00> : vector<8x128xf32>
    %35 = tpu.matmul %32, %34, %cst_19 {dimension_numbers = #tpu.dot_dimension_numbers<[1], [0], [0], [1], [0, 0, 1, 1], [], []>} : vector<8x128xbf16>, vector<128x128xbf16>, vector<8x128xf32> -> vector<8x128xf32>
    %c2 = arith.constant 2 : index
    %c0_20 = arith.constant 0 : index
    %36 = vector.load %arg2[%c2, %c0_20] : memref<4x256xf32, #tpu.memory_space<vmem>>, vector<1x128xf32>
    %c3 = arith.constant 3 : index
    %c0_21 = arith.constant 0 : index
    %37 = vector.load %arg2[%c3, %c0_21] : memref<4x256xf32, #tpu.memory_space<vmem>>, vector<1x128xf32>
    %cst_22 = arith.constant dense<0.000000e+00> : vector<128xf32>
    %38 = vector.multi_reduction <add>, %31, %cst_22 [0] : vector<8x128xf32> to vector<128xf32>
    %39 = vector.shape_cast %38 : vector<128xf32> to vector<1x128xf32>
    %cst_23 = arith.constant 8.000000e+00 : f32
    %40 = vector.broadcast %cst_23 : f32 to vector<1x128xf32>
    %41 = arith.divf %39, %40 : vector<1x128xf32>
    %42 = vector.broadcast %41 : vector<1x128xf32> to vector<8x128xf32>
    %43 = arith.subf %31, %42 : vector<8x128xf32>
    %44 = arith.mulf %43, %43 : vector<8x128xf32>
    %cst_24 = arith.constant dense<0.000000e+00> : vector<128xf32>
    %45 = vector.multi_reduction <add>, %44, %cst_24 [0] : vector<8x128xf32> to vector<128xf32>
    %46 = vector.shape_cast %45 : vector<128xf32> to vector<1x128xf32>
    %cst_25 = arith.constant 8.000000e+00 : f32
    %47 = vector.broadcast %cst_25 : f32 to vector<1x128xf32>
    %48 = arith.divf %46, %47 : vector<1x128xf32>
    %cst_26 = arith.constant 9.99999974E-6 : f32
    %49 = vector.broadcast %cst_26 : f32 to vector<1x128xf32>
    %50 = arith.addf %48, %49 : vector<1x128xf32>
    %51 = math.rsqrt %50 : vector<1x128xf32>
    %52 = arith.mulf %36, %51 : vector<1x128xf32>
    %53 = vector.broadcast %52 : vector<1x128xf32> to vector<8x128xf32>
    %54 = arith.mulf %43, %53 : vector<8x128xf32>
    %55 = vector.broadcast %37 : vector<1x128xf32> to vector<8x128xf32>
    %56 = arith.addf %54, %55 : vector<8x128xf32>
    %cst_27 = arith.constant 0.000000e+00 : f32
    %57 = vector.broadcast %cst_27 : f32 to vector<8x128xf32>
    %58 = arith.maximumf %56, %57 : vector<8x128xf32>
    %c2_28 = arith.constant 2 : index
    %c128 = arith.constant 128 : index
    %59 = vector.load %arg2[%c2_28, %c128] : memref<4x256xf32, #tpu.memory_space<vmem>>, vector<1x128xf32>
    %c3_29 = arith.constant 3 : index
    %c128_30 = arith.constant 128 : index
    %60 = vector.load %arg2[%c3_29, %c128_30] : memref<4x256xf32, #tpu.memory_space<vmem>>, vector<1x128xf32>
    %cst_31 = arith.constant dense<0.000000e+00> : vector<128xf32>
    %61 = vector.multi_reduction <add>, %35, %cst_31 [0] : vector<8x128xf32> to vector<128xf32>
    %62 = vector.shape_cast %61 : vector<128xf32> to vector<1x128xf32>
    %cst_32 = arith.constant 8.000000e+00 : f32
    %63 = vector.broadcast %cst_32 : f32 to vector<1x128xf32>
    %64 = arith.divf %62, %63 : vector<1x128xf32>
    %65 = vector.broadcast %64 : vector<1x128xf32> to vector<8x128xf32>
    %66 = arith.subf %35, %65 : vector<8x128xf32>
    %67 = arith.mulf %66, %66 : vector<8x128xf32>
    %cst_33 = arith.constant dense<0.000000e+00> : vector<128xf32>
    %68 = vector.multi_reduction <add>, %67, %cst_33 [0] : vector<8x128xf32> to vector<128xf32>
    %69 = vector.shape_cast %68 : vector<128xf32> to vector<1x128xf32>
    %cst_34 = arith.constant 8.000000e+00 : f32
    %70 = vector.broadcast %cst_34 : f32 to vector<1x128xf32>
    %71 = arith.divf %69, %70 : vector<1x128xf32>
    %cst_35 = arith.constant 9.99999974E-6 : f32
    %72 = vector.broadcast %cst_35 : f32 to vector<1x128xf32>
    %73 = arith.addf %71, %72 : vector<1x128xf32>
    %74 = math.rsqrt %73 : vector<1x128xf32>
    %75 = arith.mulf %59, %74 : vector<1x128xf32>
    %76 = vector.broadcast %75 : vector<1x128xf32> to vector<8x128xf32>
    %77 = arith.mulf %66, %76 : vector<8x128xf32>
    %78 = vector.broadcast %60 : vector<1x128xf32> to vector<8x128xf32>
    %79 = arith.addf %77, %78 : vector<8x128xf32>
    %cst_36 = arith.constant 0.000000e+00 : f32
    %80 = vector.broadcast %cst_36 : f32 to vector<8x128xf32>
    %81 = arith.maximumf %79, %80 : vector<8x128xf32>
    %82 = arith.truncf %58 : vector<8x128xf32> to vector<8x128xbf16>
    %c0_37 = arith.constant 0 : index
    %c0_38 = arith.constant 0 : index
    %c0_39 = arith.constant 0 : index
    %83 = vector.load %arg4[%c0_37, %c0_38, %c0_39] : memref<2x128x64xbf16, #tpu.memory_space<vmem>>, vector<1x128x64xbf16>
    %84 = vector.shape_cast %83 : vector<1x128x64xbf16> to vector<128x64xbf16>
    %cst_40 = arith.constant dense<0.000000e+00> : vector<8x64xf32>
    %85 = tpu.matmul %82, %84, %cst_40 {dimension_numbers = #tpu.dot_dimension_numbers<[1], [0], [0], [1], [0, 0, 1, 1], [], []>} : vector<8x128xbf16>, vector<128x64xbf16>, vector<8x64xf32> -> vector<8x64xf32>
    %86 = arith.truncf %81 : vector<8x128xf32> to vector<8x128xbf16>
    %c1_41 = arith.constant 1 : index
    %c0_42 = arith.constant 0 : index
    %c0_43 = arith.constant 0 : index
    %87 = vector.load %arg4[%c1_41, %c0_42, %c0_43] : memref<2x128x64xbf16, #tpu.memory_space<vmem>>, vector<1x128x64xbf16>
    %88 = vector.shape_cast %87 : vector<1x128x64xbf16> to vector<128x64xbf16>
    %cst_44 = arith.constant dense<0.000000e+00> : vector<8x64xf32>
    %89 = tpu.matmul %86, %88, %cst_44 {dimension_numbers = #tpu.dot_dimension_numbers<[1], [0], [0], [1], [0, 0, 1, 1], [], []>} : vector<8x128xbf16>, vector<128x64xbf16>, vector<8x64xf32> -> vector<8x64xf32>
    %90 = tpu.concatenate %85, %89 in 1 : vector<8x64xf32>, vector<8x64xf32> -> vector<8x128xf32>
    %c0_45 = arith.constant 0 : index
    %c0_46 = arith.constant 0 : index
    %91 = vector.load %arg5[%c0_45, %c0_46] : memref<8x128xf32, #tpu.memory_space<vmem>>, vector<8x128xf32>
    tpu.vector_store %arg5[%c0_45, %c0_46], %90 {strides = array<i32>} : memref<8x128xf32, #tpu.memory_space<vmem>>, vector<8x128xf32>,
    return
  }
}

</mosaic_0001>

<bundles_post_ra>
// kernel: tpu_custom_call.1
= control target key start
LH: loop header
LB: loop body
LE: loop exit
PB: predicated region body
PF: predicated region fallthrough
CT: control target
= control target key end

     0   :  { %10 = vsyncpa [#allocation3], 0  ;;  %s1253_s0 = inlined_call_operand.vmem [shape: f32[8,64], index: 0, kind: input, shape index: {}]   ;;  %s1254_s1 = inlined_call_operand.vmem [shape: bf16[64,256], index: 1, kind: input, shape index: {}]   ;;  %s1255_s2 = inlined_call_operand.hbm [shape: f32[4,256], index: 2, kind: input, shape index: {}]   ;;  %s1256_s3 = inlined_call_operand.vmem [shape: bf16[2,128,128], index: 3, kind: input, shape index: {}]   ;;  %s1257_s4 = inlined_call_operand.vmem [shape: bf16[2,128,64], index: 4, kind: input, shape index: {}]   ;;  %s1258_s5 = inlined_call_operand.hbm [shape: f32[8,128], index: 5, kind: output, shape index: {}]  }
   0x1   :  { %11 = vsyncpa [#allocation4], 0  ;;  %s1021_s18 = smov [#allocation2]   ;;  %s973_s22 = scalar_lea.hbm %s1255_s2, 128 }
   0x2   :  { %s22_s19 = sshll.u32 %s1021_s18, 4  ;;  %p974_p0 = scmp.ne.s32.totalorder %s1255_s2, %s973_s22  ;;  %s23_s19 = int_to_ptr.vmem [resolvable:$true] %s22_s19 }
   0x3   :  { %p977_p1 = scmp.lt.u32.totalorder %s973_s22, %s1255_s2 }
   0x5   :  { %p979_p2 = pnand %p977_p1, %p974_p0 }
   0x7   :  { %982 = shalt.err (!%p979_p2)
}
   0x8   :  { %s983_s27 = scalar_lea.vmem %s23_s19, 128  ;;  %p988_p4 = scmp.lt.s32.totalorder %s23_s19, %s23_s19 }
   0x9   :  { %p984_p3 = scmp.ne.s32.totalorder %s23_s19, %s983_s27  ;;  %p989_p5 = scmp.lt.s32.totalorder %s983_s27, %s983_s27 }
   0xb   :  { %p990_p6 = por %p989_p5, %p988_p4 }
   0xd   :  { %p991_p7 = pnand %p990_p6, %p984_p3 }
   0xf   :  { %994 = shalt.err (!%p991_p7)
}
  0x10   :  { %25 = dma.hbm_to_vmem [thread:$0]  %s1255_s2, 128, %s23_s19, [#allocation3]  }
  0x11   :  { %1017 = dma.done.wait [#allocation3], 128  }
  0x12   :  { %1018 = vsyncadd [#allocation3], 4294967168  ;;  %v1022_v0 = vmov 0   ;;  %v921_v1 = vld [vmem:[%s1254_s1 + $0x4] ss:$8 sps:$4 sm:$0xff]   ;;  %vm84_vm0 = vcmask 523264  }
  0x13   :  { %120 = vmatprep.mubr.bf16.mxu0 %v1022_v0  ;;  %v923_v2 = vld [vmem:[%s1254_s1] ss:$8 sps:$4 sm:$0xff]   ;;  %88 = vmatprep.subr.bf16.mxu0 %v921_v1  ;;  %v924_v3 = vld [vmem:[%s1254_s1 + $0x14] ss:$8 sps:$4 sm:$0xff]   ;;  %v926_v4 = vld [vmem:[%s1254_s1 + $0x10] ss:$8 sps:$4 sm:$0xff]  }
  0x14   :  { %89 = vmatpush1.bf16.msra.mxu0 %v923_v2  ;;  %v927_v5 = vld [vmem:[%s1254_s1 + $0x24] ss:$8 sps:$4 sm:$0xff]   ;;  %v929_v6 = vld [vmem:[%s1254_s1 + $0x20] ss:$8 sps:$4 sm:$0xff]   ;;  %v930_v7 = vld [vmem:[%s1254_s1 + $0x34] ss:$8 sps:$4 sm:$0xff]  }
  0x15   :  { %90 = vmatprep.subr.bf16.mxu0 %v924_v3  ;;  %v932_v8 = vld [vmem:[%s1254_s1 + $0x30] ss:$8 sps:$4 sm:$0xff]   ;;  %v34_v9 = vld [vmem:[%s1253_s0] sm:$0xff]  ;;  %v1023_v13 = vmov 0.0   ;;  %v935_v14 = vld [vmem:[%s1256_s3 + $0x8] sm:$0xff]   ;;  %vm1024_vm1 = vmmov 0  }
  0x16   :  { %v35_v10 = vpack.c.bf16 %v34_v9, %v34_v9  ;;  %v933_v11 = vld [vmem:[%s1256_s3] sm:$0xff]   ;;  %834 = vmatprep.subr.bf16.mxu1 %v1023_v13  ;;  %v936_v15 = vld [vmem:[%s1256_s3 + $0x48] sm:$0xff]   ;;  %v937_v16 = vld [vmem:[%s1256_s3 + $0x10] sm:$0xff]   ;;  %850 = vmatprep.mubr.msk.bf16.mxu1 %vm1024_vm1, %v1023_v13  ;;  %v1025_v2 = vmov 1966171168   ;;  %s1027_s26 = smov [#allocation5]  }
  0x17   :  { %v934_v12 = vld [vmem:[%s1256_s3 + $0x40] sm:$0xff]   ;;  %835 = vmatpush3.bf16.msra.mxu1 %v933_v11  ;;  %v938_v17 = vld [vmem:[%s1256_s3 + $0x50] sm:$0xff]   ;;  %v939_v18 = vld [vmem:[%s1256_s3 + $0x18] sm:$0xff]   ;;  %v173_v3 = vunpack.c.l.s4 %v1025_v2  ;;  %s714_s27 = sshll.u32 %s1027_s26, 4  ;;  %s715_s27 = int_to_ptr.vmem [resolvable:$true] %s714_s27 }
  0x18   :  { %91 = vmatpush1.bf16.msra.mxu0 %v926_v4  ;;  %836 = vmatprep.subr.bf16.mxu1 %v1023_v13  ;;  %v940_v19 = vld [vmem:[%s1256_s3 + $0x58] sm:$0xff]   ;;  %v941_v20 = vld [vmem:[%s1256_s3 + $0x20] sm:$0xff]   ;;  %v943_v22 = vld [vmem:[%s1256_s3 + $0x28] sm:$0xff]   ;;  %v175_v4 = vlaneseq  ;;  %s995_s28 = scalar_lea.vmem %s715_s27, 128  ;;  %p1000_p9 = scmp.lt.s32.totalorder %s715_s27, %s715_s27 }
  0x19   :  { %92 = vmatprep.subr.bf16.mxu0 %v927_v5  ;;  %v942_v21 = vld [vmem:[%s1256_s3 + $0x60] sm:$0xff]   ;;  %v944_v23 = vld [vmem:[%s1256_s3 + $0x68] sm:$0xff]   ;;  %v945_v24 = vld [vmem:[%s1256_s3 + $0x30] sm:$0xff]   ;;  %v174_v5 = vunpack.c.0.s8 %v173_v3  ;;  %p996_p8 = scmp.ne.s32.totalorder %s715_s27, %s995_s28  ;;  %p1001_p10 = scmp.lt.s32.totalorder %s995_s28, %s995_s28 }
  0x1a   :  { %v946_v25 = vld [vmem:[%s1256_s3 + $0x70] sm:$0xff]   ;;  %v947_v26 = vld [vmem:[%s1256_s3 + $0x38] sm:$0xff]  }
  0x1b   :  { %837 = vmatpush3.bf16.msra.mxu1 %v935_v14  ;;  %v948_v27 = vld [vmem:[%s1256_s3 + $0x78] sm:$0xff]   ;;  %p1002_p11 = por %p1001_p10, %p1000_p9 }
  0x1c   :  { %93 = vmatpush1.bf16.msra.mxu0 %v929_v6  ;;  %838 = vmatprep.subr.bf16.mxu1 %v1023_v13  ;;  %v176_v6 = vshrl.u32 %v175_v4, 7 }
  0x1d   :  { %94 = vmatprep.subr.bf16.mxu0 %v930_v7  ;;  %p1003_p12 = pnand %p1002_p11, %p996_p8 }
  0x1f   :  { %839 = vmatpush3.bf16.msra.mxu1 %v937_v16  ;;  %v1168_v16 = vsub.s32 0, %v176_v6 }
  0x20   :  { %95 = vmatpush1.bf16.msra.mxu0 %v932_v8  ;;  %840 = vmatprep.subr.bf16.mxu1 %v1023_v13  ;;  %v177_v8 = vsub.s32 %v174_v5, %v176_v6 }
  0x21   :  { %854 = vmatprep.subr.bf16.mxu0 %v1023_v13 }
  0x23   :  { %731 = vmatmul.mubr.msk.bf16.vlgmr.msra.gmra.mrb[0].mxu0 %vm84_vm0, %v35_v10  ;;  %841 = vmatpush3.bf16.msra.mxu1 %v939_v18 }
  0x24   :  { %855 = vmatpush3.bf16.msra.mxu0 %v934_v12  ;;  %842 = vmatprep.subr.bf16.mxu1 %v1023_v13  ;;  %v129_v12 = vld [vmem:[#allocation2] ss:$4 sm:$0x3] }
  0x25   :  { %856 = vmatprep.subr.bf16.mxu0 %v1023_v13  ;;  %870 = vmatprep.mubr.msk.bf16.mxu0 %vm1024_vm1, %v1023_v13 }
  0x27   :  { %843 = vmatpush3.bf16.msra.mxu1 %v941_v20 }
  0x28   :  { %857 = vmatpush3.bf16.msra.mxu0 %v936_v15  ;;  %844 = vmatprep.subr.bf16.mxu1 %v1023_v13  ;;  %v195_v15 = vsub.s32 1, %v176_v6 }
  0x29   :  { %858 = vmatprep.subr.bf16.mxu0 %v1023_v13 }
  0x2b   :  { %845 = vmatpush3.bf16.msra.mxu1 %v943_v22 }
  0x2c   :  { %859 = vmatpush3.bf16.msra.mxu0 %v938_v17  ;;  %846 = vmatprep.subr.bf16.mxu1 %v1023_v13  ;;  %v131_v17 = vld [vmem:[#allocation2 + $0x1] ss:$4 sm:$0x3] }
  0x2d   :  { %860 = vmatprep.subr.bf16.mxu0 %v1023_v13  ;;  %v209_v20 = vrot.slane %v131_v17, %v195_v15  ;;  %v205_v22 = vrot.slane %v131_v17, %v1168_v16 }
  0x2f   :  { %847 = vmatpush3.bf16.msra.mxu1 %v945_v24 }
  0x30   :  { %861 = vmatpush3.bf16.msra.mxu0 %v940_v19  ;;  %848 = vmatprep.subr.bf16.mxu1 %v1023_v13 }
  0x31   :  { %862 = vmatprep.subr.bf16.mxu0 %v1023_v13 }
  0x33   :  { %849 = vmatpush3.bf16.msra.mxu1 %v947_v26 }
  0x34   :  { %863 = vmatpush3.bf16.msra.mxu0 %v942_v21  ;;  %874 = vmatprep.subr.bf16.mxu1 %v1023_v13 }
  0x35   :  { %864 = vmatprep.subr.bf16.mxu0 %v1023_v13 }
  0x38   :  { %865 = vmatpush3.bf16.msra.mxu0 %v944_v23 }
  0x39   :  { %866 = vmatprep.subr.bf16.mxu0 %v1023_v13 }
  0x3c   :  { %867 = vmatpush3.bf16.msra.mxu0 %v946_v25 }
  0x3d   :  { %868 = vmatprep.subr.bf16.mxu0 %v1023_v13 }
  0x40   :  { %869 = vmatpush3.bf16.msra.mxu0 %v948_v27 }
  0x41   :  { %894 = vmatprep.subr.bf16.mxu0 %v1023_v13 }
  0xf6   :  { %v122_v28 = vpop.f32.mrb[0].mxu0 }
  0xf7   :  { %v132_v29 = vrot.slane %v122_v28, 4  ;;  %v124_v30 = vpop.f32.mrb[1].mxu0 }
  0xf8   :  { %v138_v31 = vrot.slane %v124_v30, 4  ;;  %v126_v32 = vpop.f32.mrb[2].mxu0 }
  0xf9   :  { %v133_v33 = vadd.f32 %v132_v29, %v122_v28  ;;  %v127_v34 = vpop.f32.mrb[3].mxu0  ;;  %v950_v32 = vld [vmem:[%s1257_s4 + $0x40] sm:$0xff]  }
  0xfa   :  { %v139_v35 = vadd.f32 %v138_v31, %v124_v30  ;;  %v949_v31 = vld [vmem:[%s1257_s4] sm:$0xff]   ;;  %v952_v34 = vld [vmem:[%s1257_s4 + $0x48] sm:$0xff]  }
  0xfb   :  { %v134_v36 = vrot.slane %v133_v33, 2 }
  0xfc   :  { %v140_v37 = vrot.slane %v139_v35, 2 }
  0xfd   :  { %v135_v38 = vadd.f32 %v134_v36, %v133_v33  ;;  %v951_v33 = vld [vmem:[%s1257_s4 + $0x8] sm:$0xff]   ;;  %v954_v36 = vld [vmem:[%s1257_s4 + $0x50] sm:$0xff]  }
  0xfe   :  { %v141_v39 = vadd.f32 %v140_v37, %v139_v35  ;;  %v953_v35 = vld [vmem:[%s1257_s4 + $0x10] sm:$0xff]   ;;  %v955_v37 = vld [vmem:[%s1257_s4 + $0x18] sm:$0xff]  }
  0xff   :  { %v136_v40 = vrot.slane %v135_v38, 1 }
 0x100   :  { %v142_v41 = vrot.slane %v141_v39, 1 }
 0x101   :  { %v137_v42 = vadd.f32 %v136_v40, %v135_v38  ;;  %v956_v38 = vld [vmem:[%s1257_s4 + $0x58] sm:$0xff]   ;;  %v958_v40 = vld [vmem:[%s1257_s4 + $0x60] sm:$0xff]  }
 0x102   :  { %v143_v43 = vadd.f32 %v142_v41, %v141_v39  ;;  %v957_v39 = vld [vmem:[%s1257_s4 + $0x20] sm:$0xff]   ;;  %v959_v41 = vld [vmem:[%s1257_s4 + $0x28] sm:$0xff]  }
 0x103   :  { %v145_v44 = vmul.f32 0.125, %v137_v42  ;;  %v960_v42 = vld [vmem:[%s1257_s4 + $0x68] sm:$0xff]  }
 0x104   :  { %v146_v45 = vmul.f32 0.125, %v143_v43  ;;  %v961_v43 = vld [vmem:[%s1257_s4 + $0x30] sm:$0xff]  }
 0x105   :  { %v147_v46 = vsub.f32 %v122_v28, %v145_v44  ;;  %v962_v44 = vld [vmem:[%s1257_s4 + $0x70] sm:$0xff]  }
 0x106   :  { %v148_v47 = vsub.f32 %v124_v30, %v146_v45  ;;  %v963_v45 = vld [vmem:[%s1257_s4 + $0x38] sm:$0xff]  }
 0x107   :  { %v149_v48 = vmul.f32 %v147_v46, %v147_v46 }
 0x108   :  { %v150_v49 = vmul.f32 %v148_v47, %v148_v47 }
 0x109   :  { %v151_v50 = vrot.slane %v149_v48, 4 }
 0x10a   :  { %v157_v51 = vrot.slane %v150_v49, 4 }
 0x10b   :  { %v152_v52 = vadd.f32 %v151_v50, %v149_v48 }
 0x10c   :  { %v158_v53 = vadd.f32 %v157_v51, %v150_v49 }
 0x10d   :  { %v153_v54 = vrot.slane %v152_v52, 2 }
 0x10e   :  { %v159_v55 = vrot.slane %v158_v53, 2 }
 0x10f   :  { %v154_v56 = vadd.f32 %v153_v54, %v152_v52 }
 0x110   :  { %v160_v57 = vadd.f32 %v159_v55, %v158_v53 }
 0x111   :  { %v155_v58 = vrot.slane %v154_v56, 1 }
 0x112   :  { %v161_v59 = vrot.slane %v160_v57, 1 }
 0x113   :  { %v156_v60 = vadd.f32 %v155_v58, %v154_v56 }
 0x114   :  { %v162_v61 = vadd.f32 %v161_v59, %v160_v57 }
 0x115   :  { %v163_v62 = vmul.f32 0.125, %v156_v60 }
 0x116   :  { %v164_v63 = vmul.f32 0.125, %v162_v61 }
 0x117   :  { %v165_v0 = vadd.f32 1e-05, %v163_v62 }
 0x118   :  { %v166_v1 = vadd.f32 1e-05, %v164_v63 }
 0x119   :  { %965 = vrsqrt.f32 %v165_v0 }
 0x11a   :  { %967 = vrsqrt.f32 %v166_v1 }
 0x123   :  { %v966_v7 = vpop.eup %965 }
 0x124   :  { %v968_v9 = vpop.eup %967 }
 0x125   :  { %v171_v10 = vcombine.low %v966_v7, %v968_v9 }
 0x127   :  { %v178_v11 = vrot.slane %v171_v10, %v177_v8 }
 0x129   :  { %v185_v14 = vrot.slane %v178_v11, %v177_v8 }
 0x12b   :  { %v187_v18 = vmul.f32 %v185_v14, %v129_v12 }
 0x12d   :  { %v196_v19 = vrot.slane %v187_v18, %v195_v15  ;;  %v192_v21 = vrot.slane %v187_v18, %v1168_v16 }
 0x12f   :  { %v200_v23 = vmul.f32 %v196_v19, %v148_v47  ;;  %v199_v24 = vmul.f32 %v192_v21, %v147_v46  ;;  %v964_v46 = vld [vmem:[%s1257_s4 + $0x78] sm:$0xff]   ;;  %s1026_s4 = smov 64  }
 0x131   :  { %v213_v25 = vadd.f32 %v209_v20, %v200_v23  ;;  %v212_v26 = vadd.f32 %v205_v22, %v199_v24 }
 0x133   :  { %v214_v27 = vmax.f32 %v212_v26, 0.0  ;;  %v215_v28 = vmax.f32 %v213_v25, 0.0  ;;  %v427_v26 = vld [vmem:[#allocation2 + $0x2] sm:$0x1] }
 0x135   :  { %v216_v29 = vpack.c.bf16 %v214_v27, %v214_v27  ;;  %v217_v30 = vpack.c.bf16 %v215_v28, %v215_v28  ;;  %v459_v27 = vld [vmem:[#allocation2 + $0x6] sm:$0x1] }
 0x137   :  { %851 = vmatmul.mubr.bf16.vlgmr.msra.gmra.mrb[0].mxu1 %v216_v29  ;;  %871 = vmatmul.mubr.bf16.vlgmr.msra.gmra.mrb[4].mxu0 %v217_v30 }
 0x138   :  { %890 = vmatprep.mubr.msk.bf16.mxu1 %vm1024_vm1, %v1023_v13  ;;  %910 = vmatprep.mubr.msk.bf16.mxu0 %vm1024_vm1, %v1023_v13 }
 0x139   :  { %875 = vmatpush3.bf16.msra.mxu1 %v949_v31  ;;  %895 = vmatpush3.bf16.msra.mxu0 %v950_v32 }
 0x13a   :  { %876 = vmatprep.subr.bf16.mxu1 %v1023_v13  ;;  %896 = vmatprep.subr.bf16.mxu0 %v1023_v13 }
 0x13d   :  { %877 = vmatpush3.bf16.msra.mxu1 %v951_v33  ;;  %897 = vmatpush3.bf16.msra.mxu0 %v952_v34  ;;  %v764_v33 = vld [vmem:[#allocation2 + $0x3] ss:$0 sm:$0xff] }
 0x13e   :  { %878 = vmatprep.subr.bf16.mxu1 %v1023_v13  ;;  %898 = vmatprep.subr.bf16.mxu0 %v1023_v13 }
 0x141   :  { %879 = vmatpush3.bf16.msra.mxu1 %v953_v35  ;;  %899 = vmatpush3.bf16.msra.mxu0 %v954_v36  ;;  %v765_v36 = vld [vmem:[#allocation2 + $0x7] ss:$0 sm:$0xff] }
 0x142   :  { %880 = vmatprep.subr.bf16.mxu1 %v1023_v13  ;;  %900 = vmatprep.subr.bf16.mxu0 %v1023_v13 }
 0x145   :  { %881 = vmatpush3.bf16.msra.mxu1 %v955_v37  ;;  %901 = vmatpush3.bf16.msra.mxu0 %v956_v38 }
 0x146   :  { %882 = vmatprep.subr.bf16.mxu1 %v1023_v13  ;;  %902 = vmatprep.subr.bf16.mxu0 %v1023_v13 }
 0x149   :  { %883 = vmatpush3.bf16.msra.mxu1 %v957_v39  ;;  %903 = vmatpush3.bf16.msra.mxu0 %v958_v40 }
 0x14a   :  { %884 = vmatprep.subr.bf16.mxu1 %v1023_v13  ;;  %904 = vmatprep.subr.bf16.mxu0 %v1023_v13 }
 0x14d   :  { %885 = vmatpush3.bf16.msra.mxu1 %v959_v41  ;;  %905 = vmatpush3.bf16.msra.mxu0 %v960_v42 }
 0x14e   :  { %886 = vmatprep.subr.bf16.mxu1 %v1023_v13  ;;  %906 = vmatprep.subr.bf16.mxu0 %v1023_v13 }
 0x151   :  { %887 = vmatpush3.bf16.msra.mxu1 %v961_v43  ;;  %907 = vmatpush3.bf16.msra.mxu0 %v962_v44 }
 0x152   :  { %888 = vmatprep.subr.bf16.mxu1 %v1023_v13  ;;  %908 = vmatprep.subr.bf16.mxu0 %v1023_v13 }
 0x155   :  { %889 = vmatpush3.bf16.msra.mxu1 %v963_v45  ;;  %909 = vmatpush3.bf16.msra.mxu0 %v964_v46 }
 0x20a   :  { %v316_v47 = vpop.f32.mrb[0].mxu1  ;;  %v421_v48 = vpop.f32.mrb[4].mxu0 }
 0x20b   :  { %v429_v49 = vrot.slane %v316_v47, 4  ;;  %v461_v50 = vrot.slane %v421_v48, 4  ;;  %v852_v51 = vpop.f32.mrb[1].mxu1  ;;  %v872_v52 = vpop.f32.mrb[5].mxu0 }
 0x20c   :  { %v319_v53 = vpop.f32.mrb[2].mxu1  ;;  %v424_v54 = vpop.f32.mrb[6].mxu0 }
 0x20d   :  { %v430_v55 = vadd.f32 %v429_v49, %v316_v47  ;;  %v462_v13 = vadd.f32 %v461_v50, %v421_v48  ;;  %v853_v56 = vpop.f32.mrb[3].mxu1  ;;  %v873_v57 = vpop.f32.mrb[7].mxu0 }
 0x20f   :  { %v431_v58 = vrot.slane %v430_v55, 2  ;;  %v463_v59 = vrot.slane %v462_v13, 2 }
 0x211   :  { %v432_v60 = vadd.f32 %v431_v58, %v430_v55  ;;  %v464_v61 = vadd.f32 %v463_v59, %v462_v13 }
 0x213   :  { %v433_v62 = vrot.slane %v432_v60, 1  ;;  %v465_v63 = vrot.slane %v464_v61, 1 }
 0x215   :  { %v434_v0 = vadd.f32 %v433_v62, %v432_v60  ;;  %v466_v1 = vadd.f32 %v465_v63, %v464_v61 }
 0x217   :  { %v435_v2 = vmul.f32 0.125, %v434_v0  ;;  %v467_v3 = vmul.f32 0.125, %v466_v1 }
 0x219   :  { %v436_v4 = vsub.f32 %v316_v47, %v435_v2  ;;  %v468_v5 = vsub.f32 %v421_v48, %v467_v3 }
 0x21b   :  { %v437_v6 = vmul.f32 %v436_v4, %v436_v4  ;;  %v469_v7 = vmul.f32 %v468_v5, %v468_v5 }
 0x21d   :  { %v438_v8 = vrot.slane %v437_v6, 4  ;;  %v470_v9 = vrot.slane %v469_v7, 4 }
 0x21f   :  { %v439_v10 = vadd.f32 %v438_v8, %v437_v6  ;;  %v471_v11 = vadd.f32 %v470_v9, %v469_v7 }
 0x221   :  { %v440_v12 = vrot.slane %v439_v10, 2  ;;  %v472_v14 = vrot.slane %v471_v11, 2 }
 0x223   :  { %v441_v15 = vadd.f32 %v440_v12, %v439_v10  ;;  %v473_v17 = vadd.f32 %v472_v14, %v471_v11 }
 0x225   :  { %v442_v18 = vrot.slane %v441_v15, 1  ;;  %v474_v19 = vrot.slane %v473_v17, 1 }
 0x227   :  { %v443_v20 = vadd.f32 %v442_v18, %v441_v15  ;;  %v475_v21 = vadd.f32 %v474_v19, %v473_v17 }
 0x229   :  { %v444_v22 = vmul.f32 0.125, %v443_v20  ;;  %v476_v23 = vmul.f32 0.125, %v475_v21 }
 0x22b   :  { %v445_v24 = vadd.f32 1e-05, %v444_v22  ;;  %v477_v25 = vadd.f32 1e-05, %v476_v23 }
 0x22d   :  { %969 = vrsqrt.f32 %v445_v24 }
 0x22e   :  { %971 = vrsqrt.f32 %v477_v25 }
 0x237   :  { %v970_v28 = vpop.eup %969 }
 0x238   :  { %v972_v29 = vpop.eup %971  ;;  %v447_v30 = vmul.f32 %v970_v28, %v427_v26 }
 0x239   :  { %v479_v31 = vmul.f32 %v972_v29, %v459_v27 }
 0x23a   :  { %v451_v32 = vrot.slane %v447_v30, %v1168_v16 }
 0x23b   :  { %v483_v34 = vrot.slane %v479_v31, %v1168_v16 }
 0x23c   :  { %v452_v35 = vmul.f32 %v451_v32, %v436_v4 }
 0x23d   :  { %v484_v37 = vmul.f32 %v483_v34, %v468_v5 }
 0x23e   :  { %v457_v38 = vadd.f32 %v764_v33, %v452_v35 }
 0x23f   :  { %v489_v39 = vadd.f32 %v765_v36, %v484_v37 }
 0x240   :  { %v458_v40 = vmax.f32 %v457_v38, 0.0 }
 0x241   :  { %v490_v41 = vmax.f32 %v489_v39, 0.0 }
 0x242   :  { %v491_v42 = vpack.c.bf16 %v458_v40, %v458_v40 }
 0x243   :  { %v596_v43 = vpack.c.bf16 %v490_v41, %v490_v41 }
 0x244   :  { %891 = vmatmul.mubr.bf16.vlgmr.msra.gmra.mrb[4].mxu1 %v491_v42 }
 0x245   :  { %911 = vmatmul.mubr.bf16.vlgmr.msra.gmra.mrb[8].mxu0 %v596_v43 }
 0x317   :  { %v590_v44 = vpop.f32.mrb[4].mxu1 }
 0x318   :  { %v696_v45 = vpop.f32.mrb[8].mxu0  ;;  %v892_v46 = vpop.f32.mrb[5].mxu1 }
 0x319   :  { %v912_v47 = vpop.f32.mrb[9].mxu0  ;;  %703 = vrot.lane.b32.xlu0 %v696_v45, %s1026_s4  ;;  %v593_v48 = vpop.f32.mrb[6].mxu1 }
 0x31a   :  { %v699_v49 = vpop.f32.mrb[10].mxu0  ;;  %v893_v16 = vpop.f32.mrb[7].mxu1 }
 0x31b   :  { %v913_v50 = vpop.f32.mrb[11].mxu0 }
 0x38b   :  { %v704_v51 = vpop.permute.xlu0 %703 }
 0x38c   :  { %v706_v52 = vsel %vm84_vm0, %v590_v44, %v704_v51 }
 0x38d   :  { %707 = vst [vmem:[#allocation5] sm:$0xff] %v706_v52 }
 0x38e   :  { %1006 = shalt.err (!%p1003_p12)
}
 0x38f   :  { %s1007_s6 = scalar_lea.hbm %s1258_s5, 128 }
 0x390   :  { %p1008_p13 = scmp.ne.s32.totalorder %s1258_s5, %s1007_s6  ;;  %p1011_p0 = scmp.lt.u32.totalorder %s1007_s6, %s1258_s5 }
 0x392   :  { %p1013_p1 = pnand %p1011_p0, %p1008_p13 }
 0x394   :  { %1016 = shalt.err (!%p1013_p1)
}
 0x395   :  { %717 = dma.vmem_to_hbm [thread:$0]  %s715_s27, 128, %s1258_s5, [#allocation4]  }
 0x396   :  { %1019 = dma.done.wait [#allocation4], 128  }
 0x397   :  { %1020 = vsyncadd [#allocation4], 4294967168 }
 0x398   :  { %721 = vsyncpa [#allocation3], 1 }
 0x399   :  { %722 = vsyncpa [#allocation4], 1 }

</bundles_post_ra>
